<compile_context>
chip_gen: v6e
topology: v6e:2x2x1
jax: 0.10.0
libtpu: 0.0.40
codegen_flags: <defaults>
</compile_context>

<pallas_src>
import jax
import jax.numpy as jnp
from jax.experimental import pallas as pl
from jax.experimental.pallas import tpu as pltpu


def _pair(v):
    if isinstance(v, (tuple, list)):
        return int(v[0]), int(v[1])
    return int(v), int(v)


def _pool_out_size(in_size, k, s, p, ceil_mode):
    """Output extent, matching PyTorch pooling shape math."""
    if ceil_mode:
        out = (in_size + 2 * p - k + s - 1) // s + 1
        # PyTorch rule: the last window must start inside the input or left pad.
        if (out - 1) * s >= in_size + p:
            out -= 1
    else:
        out = (in_size + 2 * p - k) // s + 1
    return out


def _windows(in_size, k, s, p, out_size, count_include_pad):
    """Static per-output-index (start_clamped, end_clamped, divisor_count)."""
    wins = []
    for i in range(out_size):
        start = i * s - p
        end = start + k
        if count_include_pad:
            # PyTorch pool_size component: window clipped at input + padding.
            cnt = min(end, in_size + p) - start
        else:
            # Only elements that land in the real (unpadded) input.
            cnt = min(end, in_size) - max(start, 0)
        s_cl = max(start, 0)
        e_cl = min(end, in_size)
        wins.append((s_cl, max(e_cl, s_cl), max(int(cnt), 1)))
    return wins


def _make_kernel(h_wins, w_wins, H, W, H_out, W_out, kH, sH, pH):
    uniform_h = (pH == 0) and (sH == kH) and (H % kH == 0) and \
        all(c == kH for (_, _, c) in h_wins)
    inv_kh = 1.0 / float(kH)

    def kernel(x_ref, o_ref):
        x = x_ref[...].astype(jnp.float32)        # (H, W, TL): lanes = (n, c) images
        tl = x.shape[-1]

        # ---- H reduction first: leading-axis sums are pure VPU adds between
        # ---- (W, TL) vreg slabs; this shrinks the tensor before any sublane work.
        if uniform_h:
            # Uniform non-overlapping windows: one reshape + one vectorized sum.
            xh = x.reshape(H_out, kH, W, tl).sum(axis=1) * inv_kh
        else:
            planes = []
            for (hs, he, cnt) in h_wins:
                if he > hs:
                    planes.append(x[hs:he].sum(axis=0) * (1.0 / float(cnt)))
                else:  # window entirely inside padding (ceil_mode corner)
                    planes.append(jnp.zeros((W, tl), jnp.float32))
            xh = jnp.stack(planes, axis=0)        # (H_out, W, TL)

        # ---- W reduction on the already-shrunk tensor (sublane-window sums).
        cols = []
        for (ws, we, cnt) in w_wins:
            if we > ws:
                cols.append(xh[:, ws:we, :].sum(axis=1) * (1.0 / float(cnt)))
            else:
                cols.append(jnp.zeros((H_out, tl), jnp.float32))
        out = jnp.stack(cols, axis=1)             # (H_out, W_out, TL) — lane-dense

        o_ref[...] = out.astype(o_ref.dtype)

    return kernel


def _pick_lane_tile(L, H, W, H_out, W_out, itemsize, vmem_budget=20 * 1024 * 1024):
    """Largest lane tile (multiple of 128, or full L) fitting the VMEM budget,
    capped so the grid keeps >= 2 steps when possible (v7x megacore)."""
    # Per-lane bytes: double-buffered in/out blocks + in-kernel f32 temporaries.
    per_lane = (2 * H * W + 2 * H_out * W_out) * itemsize \
        + (H * W + H_out * W + 2 * H_out * W_out) * 4
    if L <= 128:
        return L                                   # full-extent lane block is legal
    tl = min(L, max(1, vmem_budget // max(1, per_lane)))
    tl = max(128, (tl // 128) * 128)               # lane-aligned tile
    if L >= 256:                                   # keep >= 2 grid steps
        half = ((L + 1) // 2 + 127) // 128 * 128
        tl = min(tl, half)
    return min(tl, L)


def avg_pool2d(x, kernel_size, stride=None, padding=0, ceil_mode=False,
               count_include_pad=True):
    """x: (N, C, H, W) -> (N, C, H_out, W_out), torch.nn.AvgPool2d semantics."""
    kH, kW = _pair(kernel_size)
    sH, sW = _pair(stride if stride is not None else kernel_size)
    pH, pW = _pair(padding)
    N, C, H, W = x.shape
    H_out = _pool_out_size(H, kH, sH, pH, ceil_mode)
    W_out = _pool_out_size(W, kW, sW, pW, ceil_mode)
    h_wins = _windows(H, kH, sH, pH, H_out, count_include_pad)
    w_wins = _windows(W, kW, sW, pW, W_out, count_include_pad)

    L = N * C
    # Channels-last for the kernel: (H, W, L) puts N*C on the lane axis.
    x_cl = jnp.transpose(x.reshape(L, H, W), (1, 2, 0))

    TL = _pick_lane_tile(L, H, W, H_out, W_out, x.dtype.itemsize)
    grid = (pl.cdiv(L, TL),)

    kernel = _make_kernel(h_wins, w_wins, H, W, H_out, W_out, kH, sH, pH)

    in_bytes = x.size * x.dtype.itemsize
    out_bytes = L * H_out * W_out * x.dtype.itemsize
    cost = pl.CostEstimate(
        flops=L * H_out * W_out * (kH * kW + 2),
        transcendentals=0,
        bytes_accessed=in_bytes + out_bytes,
    )

    out_cl = pl.pallas_call(
        kernel,
        out_shape=jax.ShapeDtypeStruct((H_out, W_out, L), x.dtype),
        grid=grid,
        in_specs=[pl.BlockSpec((H, W, TL), lambda i: (0, 0, i))],
        out_specs=pl.BlockSpec((H_out, W_out, TL), lambda i: (0, 0, i)),
        compiler_params=pltpu.CompilerParams(
            dimension_semantics=("parallel",),
            vmem_limit_bytes=32 * 1024 * 1024,
        ),
        cost_estimate=cost,
    )(x_cl)

    return jnp.transpose(out_cl, (2, 0, 1)).reshape(N, C, H_out, W_out)


def _reference(x, kernel_size, stride=None, padding=0, ceil_mode=False,
               count_include_pad=True):
    """Pure-JAX reference implementing the documented AvgPool2d formula."""
    kH, kW = _pair(kernel_size)
    sH, sW = _pair(stride if stride is not None else kernel_size)
    pH, pW = _pair(padding)
    N, C, H, W = x.shape
    H_out = _pool_out_size(H, kH, sH, pH, ceil_mode)
    W_out = _pool_out_size(W, kW, sW, pW, ceil_mode)
    xp = jnp.pad(x.astype(jnp.float32), ((0, 0), (0, 0), (pH, pH), (pW, pW)))
    out = jnp.zeros((N, C, H_out, W_out), jnp.float32)
    for oh in range(H_out):
        hs = oh * sH
        he = min(hs + kH, H + 2 * pH)
        for ow in range(W_out):
            ws = ow * sW
            we = min(ws + kW, W + 2 * pW)
            s = xp[:, :, hs:he, ws:we].sum(axis=(2, 3))
            if count_include_pad:
                div = (he - hs) * (we - ws)
            else:
                div = (max(0, min(he, pH + H) - max(hs, pH)) *
                       max(0, min(we, pW + W) - max(ws, pW)))
            out = out.at[:, :, oh, ow].set(s / max(div, 1))
    return out.astype(x.dtype)


if __name__ == "__main__":
    key = jax.random.PRNGKey(0)
    N, C, H, W = 2, 4, 16, 16
    x = jax.random.normal(key, (N, C, H, W), dtype=jnp.float32)

    configs = [
        # (kernel_size, stride, padding, ceil_mode, count_include_pad)
        (3, 2, 1, False, True),                  # overlapping windows + padding
        (2, None, 0, False, True),               # uniform windows -> reshape fast path
        ((3, 2), (2, 1), (1, 0), True, False),   # non-square, ceil_mode, exclude pad
    ]
    for (ks, st, pd, cm, cip) in configs:
        out = avg_pool2d(x, ks, st, pd, cm, cip)
        out = jax.block_until_ready(out)
        ref = _reference(x, ks, st, pd, cm, cip)
        assert out.shape == ref.shape, (out.shape, ref.shape)
        assert out.dtype == x.dtype
        assert jnp.allclose(out, ref, atol=1e-5, rtol=1e-5), \
            f"Pallas output mismatch vs reference for config {(ks, st, pd, cm, cip)}"

    print("KERNEL_OK")
</pallas_src>

<mosaic_0001>
module attributes {stable_mosaic.version = 11 : i64} {
  func.func @kernel(%arg0: i32, %arg1: memref<16x16x8xf32, #tpu.memory_space<vmem>>, %arg2: memref<8x8x8xf32, #tpu.memory_space<vmem>>) attributes {dimension_semantics = [#tpu.dimension_semantics<parallel>], iteration_bounds = array<i64: 1>, scalar_prefetch = 0 : i64, scratch_operands = 0 : i64, tpu.core_type = #tpu.core_type<tc>, window_params = [{transform_indices = @transform_0, window_bounds = array<i64: 16, 16, 8>}, {transform_indices = @transform_1, window_bounds = array<i64: 8, 8, 8>}]} {
    %c0 = arith.constant 0 : index
    %c0_0 = arith.constant 0 : index
    %c0_1 = arith.constant 0 : index
    %0 = vector.load %arg1[%c0, %c0_0, %c0_1] : memref<16x16x8xf32, #tpu.memory_space<vmem>>, vector<16x16x8xf32>
    %1 = vector.extract_strided_slice %0 {offsets = [0, 0, 0], sizes = [2, 16, 8], strides = [1, 1, 1]} : vector<16x16x8xf32> to vector<2x16x8xf32>
    %cst = arith.constant dense<0.000000e+00> : vector<16x8xf32>
    %2 = vector.multi_reduction <add>, %1, %cst [0] : vector<2x16x8xf32> to vector<16x8xf32>
    %cst_2 = arith.constant 0.333333343 : f32
    %3 = vector.broadcast %cst_2 : f32 to vector<16x8xf32>
    %4 = arith.mulf %2, %3 : vector<16x8xf32>
    %5 = vector.extract_strided_slice %0 {offsets = [1, 0, 0], sizes = [3, 16, 8], strides = [1, 1, 1]} : vector<16x16x8xf32> to vector<3x16x8xf32>
    %cst_3 = arith.constant dense<0.000000e+00> : vector<16x8xf32>
    %6 = vector.multi_reduction <add>, %5, %cst_3 [0] : vector<3x16x8xf32> to vector<16x8xf32>
    %cst_4 = arith.constant 0.333333343 : f32
    %7 = vector.broadcast %cst_4 : f32 to vector<16x8xf32>
    %8 = arith.mulf %6, %7 : vector<16x8xf32>
    %9 = vector.extract_strided_slice %0 {offsets = [3, 0, 0], sizes = [3, 16, 8], strides = [1, 1, 1]} : vector<16x16x8xf32> to vector<3x16x8xf32>
    %cst_5 = arith.constant dense<0.000000e+00> : vector<16x8xf32>
    %10 = vector.multi_reduction <add>, %9, %cst_5 [0] : vector<3x16x8xf32> to vector<16x8xf32>
    %cst_6 = arith.constant 0.333333343 : f32
    %11 = vector.broadcast %cst_6 : f32 to vector<16x8xf32>
    %12 = arith.mulf %10, %11 : vector<16x8xf32>
    %13 = vector.extract_strided_slice %0 {offsets = [5, 0, 0], sizes = [3, 16, 8], strides = [1, 1, 1]} : vector<16x16x8xf32> to vector<3x16x8xf32>
    %cst_7 = arith.constant dense<0.000000e+00> : vector<16x8xf32>
    %14 = vector.multi_reduction <add>, %13, %cst_7 [0] : vector<3x16x8xf32> to vector<16x8xf32>
    %cst_8 = arith.constant 0.333333343 : f32
    %15 = vector.broadcast %cst_8 : f32 to vector<16x8xf32>
    %16 = arith.mulf %14, %15 : vector<16x8xf32>
    %17 = vector.extract_strided_slice %0 {offsets = [7, 0, 0], sizes = [3, 16, 8], strides = [1, 1, 1]} : vector<16x16x8xf32> to vector<3x16x8xf32>
    %cst_9 = arith.constant dense<0.000000e+00> : vector<16x8xf32>
    %18 = vector.multi_reduction <add>, %17, %cst_9 [0] : vector<3x16x8xf32> to vector<16x8xf32>
    %cst_10 = arith.constant 0.333333343 : f32
    %19 = vector.broadcast %cst_10 : f32 to vector<16x8xf32>
    %20 = arith.mulf %18, %19 : vector<16x8xf32>
    %21 = vector.extract_strided_slice %0 {offsets = [9, 0, 0], sizes = [3, 16, 8], strides = [1, 1, 1]} : vector<16x16x8xf32> to vector<3x16x8xf32>
    %cst_11 = arith.constant dense<0.000000e+00> : vector<16x8xf32>
    %22 = vector.multi_reduction <add>, %21, %cst_11 [0] : vector<3x16x8xf32> to vector<16x8xf32>
    %cst_12 = arith.constant 0.333333343 : f32
    %23 = vector.broadcast %cst_12 : f32 to vector<16x8xf32>
    %24 = arith.mulf %22, %23 : vector<16x8xf32>
    %25 = vector.extract_strided_slice %0 {offsets = [11, 0, 0], sizes = [3, 16, 8], strides = [1, 1, 1]} : vector<16x16x8xf32> to vector<3x16x8xf32>
    %cst_13 = arith.constant dense<0.000000e+00> : vector<16x8xf32>
    %26 = vector.multi_reduction <add>, %25, %cst_13 [0] : vector<3x16x8xf32> to vector<16x8xf32>
    %cst_14 = arith.constant 0.333333343 : f32
    %27 = vector.broadcast %cst_14 : f32 to vector<16x8xf32>
    %28 = arith.mulf %26, %27 : vector<16x8xf32>
    %29 = vector.extract_strided_slice %0 {offsets = [13, 0, 0], sizes = [3, 16, 8], strides = [1, 1, 1]} : vector<16x16x8xf32> to vector<3x16x8xf32>
    %cst_15 = arith.constant dense<0.000000e+00> : vector<16x8xf32>
    %30 = vector.multi_reduction <add>, %29, %cst_15 [0] : vector<3x16x8xf32> to vector<16x8xf32>
    %cst_16 = arith.constant 0.333333343 : f32
    %31 = vector.broadcast %cst_16 : f32 to vector<16x8xf32>
    %32 = arith.mulf %30, %31 : vector<16x8xf32>
    %33 = vector.shape_cast %4 : vector<16x8xf32> to vector<1x16x8xf32>
    %34 = vector.shape_cast %8 : vector<16x8xf32> to vector<1x16x8xf32>
    %35 = vector.shape_cast %12 : vector<16x8xf32> to vector<1x16x8xf32>
    %36 = vector.shape_cast %16 : vector<16x8xf32> to vector<1x16x8xf32>
    %37 = vector.shape_cast %20 : vector<16x8xf32> to vector<1x16x8xf32>
    %38 = vector.shape_cast %24 : vector<16x8xf32> to vector<1x16x8xf32>
    %39 = vector.shape_cast %28 : vector<16x8xf32> to vector<1x16x8xf32>
    %40 = vector.shape_cast %32 : vector<16x8xf32> to vector<1x16x8xf32>
    %41 = tpu.concatenate %33, %34, %35, %36, %37, %38, %39, %40 in 0 : vector<1x16x8xf32>, vector<1x16x8xf32>, vector<1x16x8xf32>, vector<1x16x8xf32>, vector<1x16x8xf32>, vector<1x16x8xf32>, vector<1x16x8xf32>, vector<1x16x8xf32> -> vector<8x16x8xf32>
    %42 = vector.extract_strided_slice %41 {offsets = [0, 0, 0], sizes = [8, 2, 8], strides = [1, 1, 1]} : vector<8x16x8xf32> to vector<8x2x8xf32>
    %cst_17 = arith.constant dense<0.000000e+00> : vector<8x8xf32>
    %43 = vector.multi_reduction <add>, %42, %cst_17 [1] : vector<8x2x8xf32> to vector<8x8xf32>
    %cst_18 = arith.constant 0.333333343 : f32
    %44 = vector.broadcast %cst_18 : f32 to vector<8x8xf32>
    %45 = arith.mulf %43, %44 : vector<8x8xf32>
    %46 = vector.extract_strided_slice %41 {offsets = [0, 1, 0], sizes = [8, 3, 8], strides = [1, 1, 1]} : vector<8x16x8xf32> to vector<8x3x8xf32>
    %cst_19 = arith.constant dense<0.000000e+00> : vector<8x8xf32>
    %47 = vector.multi_reduction <add>, %46, %cst_19 [1] : vector<8x3x8xf32> to vector<8x8xf32>
    %cst_20 = arith.constant 0.333333343 : f32
    %48 = vector.broadcast %cst_20 : f32 to vector<8x8xf32>
    %49 = arith.mulf %47, %48 : vector<8x8xf32>
    %50 = vector.extract_strided_slice %41 {offsets = [0, 3, 0], sizes = [8, 3, 8], strides = [1, 1, 1]} : vector<8x16x8xf32> to vector<8x3x8xf32>
    %cst_21 = arith.constant dense<0.000000e+00> : vector<8x8xf32>
    %51 = vector.multi_reduction <add>, %50, %cst_21 [1] : vector<8x3x8xf32> to vector<8x8xf32>
    %cst_22 = arith.constant 0.333333343 : f32
    %52 = vector.broadcast %cst_22 : f32 to vector<8x8xf32>
    %53 = arith.mulf %51, %52 : vector<8x8xf32>
    %54 = vector.extract_strided_slice %41 {offsets = [0, 5, 0], sizes = [8, 3, 8], strides = [1, 1, 1]} : vector<8x16x8xf32> to vector<8x3x8xf32>
    %cst_23 = arith.constant dense<0.000000e+00> : vector<8x8xf32>
    %55 = vector.multi_reduction <add>, %54, %cst_23 [1] : vector<8x3x8xf32> to vector<8x8xf32>
    %cst_24 = arith.constant 0.333333343 : f32
    %56 = vector.broadcast %cst_24 : f32 to vector<8x8xf32>
    %57 = arith.mulf %55, %56 : vector<8x8xf32>
    %58 = vector.extract_strided_slice %41 {offsets = [0, 7, 0], sizes = [8, 3, 8], strides = [1, 1, 1]} : vector<8x16x8xf32> to vector<8x3x8xf32>
    %cst_25 = arith.constant dense<0.000000e+00> : vector<8x8xf32>
    %59 = vector.multi_reduction <add>, %58, %cst_25 [1] : vector<8x3x8xf32> to vector<8x8xf32>
    %cst_26 = arith.constant 0.333333343 : f32
    %60 = vector.broadcast %cst_26 : f32 to vector<8x8xf32>
    %61 = arith.mulf %59, %60 : vector<8x8xf32>
    %62 = vector.extract_strided_slice %41 {offsets = [0, 9, 0], sizes = [8, 3, 8], strides = [1, 1, 1]} : vector<8x16x8xf32> to vector<8x3x8xf32>
    %cst_27 = arith.constant dense<0.000000e+00> : vector<8x8xf32>
    %63 = vector.multi_reduction <add>, %62, %cst_27 [1] : vector<8x3x8xf32> to vector<8x8xf32>
    %cst_28 = arith.constant 0.333333343 : f32
    %64 = vector.broadcast %cst_28 : f32 to vector<8x8xf32>
    %65 = arith.mulf %63, %64 : vector<8x8xf32>
    %66 = vector.extract_strided_slice %41 {offsets = [0, 11, 0], sizes = [8, 3, 8], strides = [1, 1, 1]} : vector<8x16x8xf32> to vector<8x3x8xf32>
    %cst_29 = arith.constant dense<0.000000e+00> : vector<8x8xf32>
    %67 = vector.multi_reduction <add>, %66, %cst_29 [1] : vector<8x3x8xf32> to vector<8x8xf32>
    %cst_30 = arith.constant 0.333333343 : f32
    %68 = vector.broadcast %cst_30 : f32 to vector<8x8xf32>
    %69 = arith.mulf %67, %68 : vector<8x8xf32>
    %70 = vector.extract_strided_slice %41 {offsets = [0, 13, 0], sizes = [8, 3, 8], strides = [1, 1, 1]} : vector<8x16x8xf32> to vector<8x3x8xf32>
    %cst_31 = arith.constant dense<0.000000e+00> : vector<8x8xf32>
    %71 = vector.multi_reduction <add>, %70, %cst_31 [1] : vector<8x3x8xf32> to vector<8x8xf32>
    %cst_32 = arith.constant 0.333333343 : f32
    %72 = vector.broadcast %cst_32 : f32 to vector<8x8xf32>
    %73 = arith.mulf %71, %72 : vector<8x8xf32>
    %74 = vector.shape_cast %45 : vector<8x8xf32> to vector<8x1x8xf32>
    %75 = vector.shape_cast %49 : vector<8x8xf32> to vector<8x1x8xf32>
    %76 = vector.shape_cast %53 : vector<8x8xf32> to vector<8x1x8xf32>
    %77 = vector.shape_cast %57 : vector<8x8xf32> to vector<8x1x8xf32>
    %78 = vector.shape_cast %61 : vector<8x8xf32> to vector<8x1x8xf32>
    %79 = vector.shape_cast %65 : vector<8x8xf32> to vector<8x1x8xf32>
    %80 = vector.shape_cast %69 : vector<8x8xf32> to vector<8x1x8xf32>
    %81 = vector.shape_cast %73 : vector<8x8xf32> to vector<8x1x8xf32>
    %82 = tpu.concatenate %74, %75, %76, %77, %78, %79, %80, %81 in 1 : vector<8x1x8xf32>, vector<8x1x8xf32>, vector<8x1x8xf32>, vector<8x1x8xf32>, vector<8x1x8xf32>, vector<8x1x8xf32>, vector<8x1x8xf32>, vector<8x1x8xf32> -> vector<8x8x8xf32>
    %c0_33 = arith.constant 0 : index
    %c0_34 = arith.constant 0 : index
    %c0_35 = arith.constant 0 : index
    %83 = vector.load %arg2[%c0_33, %c0_34, %c0_35] : memref<8x8x8xf32, #tpu.memory_space<vmem>>, vector<8x8x8xf32>
    tpu.vector_store %arg2[%c0_33, %c0_34, %c0_35], %82 {strides = array<i32>} : memref<8x8x8xf32, #tpu.memory_space<vmem>>, vector<8x8x8xf32>,
    return
  }
  func.func @transform_0(%arg0: i32) -> (i32, i32, i32) {
    %c0_i32 = arith.constant 0 : i32
    %c0_i32_0 = arith.constant 0 : i32
    %c0_i32_1 = arith.constant 0 : i32
    return %c0_i32, %c0_i32_0, %arg0 : i32, i32, i32
  }
  func.func @transform_1(%arg0: i32) -> (i32, i32, i32) {
    %c0_i32 = arith.constant 0 : i32
    %c0_i32_0 = arith.constant 0 : i32
    %c0_i32_1 = arith.constant 0 : i32
    return %c0_i32, %c0_i32_0, %arg0 : i32, i32, i32
  }
}

</mosaic_0001>

<bundles_post_ra>
// kernel: tpu_custom_call.1
= control target key start
LH: loop header
LB: loop body
LE: loop exit
PB: predicated region body
PF: predicated region fallthrough
CT: control target
= control target key end

     0   :  { %6 = vsyncpa [#allocation3], 0  ;;  %vm41_vm0 = vcmask 64512   ;;  %vm120_vm1 = vcmask 58368   ;;  %vm209_vm2 = vcmask 59392   ;;  %vm442_vm3 = vcmask 1040384   ;;  %s1451_s0 = inlined_call_operand.vmem [shape: f32[16,16,8], index: 0, kind: input, shape index: {}]   ;;  %s1452_s1 = inlined_call_operand.hbm [shape: f32[8,8,8], index: 1, kind: output, shape index: {}]  }
   0x1   :  { %v9_v0 = vld [vmem:[%s1451_s0] sm:$0xff]  ;;  %v10_v1 = vld [vmem:[%s1451_s0 + $0x8] sm:$0xff]  ;;  %v11_v2 = vld [vmem:[%s1451_s0 + $0x10] sm:$0xff]  ;;  %vm787_vm4 = vcmask 1041408   ;;  %vm796_vm5 = vcmask 1042432   ;;  %vm805_vm6 = vcmask 1043456  }
   0x2   :  { %v12_v3 = vld [vmem:[%s1451_s0 + $0x18] sm:$0xff]  ;;  %v13_v4 = vld [vmem:[%s1451_s0 + $0x20] sm:$0xff]  ;;  %v42_v5 = vsel %vm41_vm0, %v9_v0, 0.0  ;;  %v45_v6 = vsel %vm41_vm0, %v10_v1, 0.0  ;;  %v14_v7 = vld [vmem:[%s1451_s0 + $0x28] sm:$0xff]  ;;  %v43_v10 = vsel %vm41_vm0, %v11_v2, 0.0 }
   0x3   :  { %v15_v8 = vld [vmem:[%s1451_s0 + $0x30] sm:$0xff]  ;;  %v16_v9 = vld [vmem:[%s1451_s0 + $0x38] sm:$0xff]  ;;  %v46_v11 = vsel %vm41_vm0, %v12_v3, 0.0  ;;  %v50_v12 = vsel %vm41_vm0, %v13_v4, 0.0  ;;  %v17_v13 = vld [vmem:[%s1451_s0 + $0x40] sm:$0xff]  ;;  %v44_v15 = vadd.f32 %v43_v10, %v42_v5  ;;  %v54_v20 = vsel %vm41_vm0, %v14_v7, 0.0 }
   0x4   :  { %v19_v14 = vld [vmem:[%s1451_s0 + $0x50] sm:$0xff]  ;;  %v47_v16 = vadd.f32 %v46_v11, %v45_v6  ;;  %v51_v17 = vadd.f32 %v50_v12, %v43_v10  ;;  %v52_v18 = vsel %vm41_vm0, %v15_v8, 0.0  ;;  %v18_v19 = vld [vmem:[%s1451_s0 + $0x48] sm:$0xff]  ;;  %v60_v21 = vsel %vm41_vm0, %v17_v13, 0.0  ;;  %v20_v22 = vld [vmem:[%s1451_s0 + $0x58] sm:$0xff] }
   0x5   :  { %v21_v23 = vld [vmem:[%s1451_s0 + $0x60] sm:$0xff]  ;;  %v55_v25 = vadd.f32 %v54_v20, %v46_v11  ;;  %v56_v26 = vsel %vm41_vm0, %v16_v9, 0.0  ;;  %v61_v27 = vadd.f32 %v60_v21, %v52_v18  ;;  %v22_v28 = vld [vmem:[%s1451_s0 + $0x68] sm:$0xff]  ;;  %v23_v29 = vld [vmem:[%s1451_s0 + $0x70] sm:$0xff]  ;;  %v957_v30 = vmul.f32 0.33333334, %v44_v15 }
   0x6   :  { %v53_v24 = vadd.f32 %v52_v18, %v51_v17  ;;  %v62_v31 = vsel %vm41_vm0, %v19_v14, 0.0  ;;  %v24_v32 = vld [vmem:[%s1451_s0 + $0x78] sm:$0xff]  ;;  %v25_v33 = vld [vmem:[%s1451_s0 + $0x80] sm:$0xff]  ;;  %v966_v34 = vmul.f32 0.33333334, %v47_v16  ;;  %v64_v37 = vsel %vm41_vm0, %v18_v19, 0.0 }
   0x7   :  { %v57_v35 = vadd.f32 %v56_v26, %v55_v25  ;;  %v63_v36 = vadd.f32 %v62_v31, %v61_v27  ;;  %v26_v38 = vld [vmem:[%s1451_s0 + $0x88] sm:$0xff]  ;;  %v27_v39 = vld [vmem:[%s1451_s0 + $0x90] sm:$0xff]  ;;  %v65_v41 = vadd.f32 %v64_v37, %v56_v26  ;;  %v66_v42 = vsel %vm41_vm0, %v20_v22, 0.0  ;;  %v28_v48 = vld [vmem:[%s1451_s0 + $0x98] sm:$0xff] }
   0x8   :  { %v975_v40 = vmul.f32 0.33333334, %v53_v24  ;;  %v70_v43 = vsel %vm41_vm0, %v21_v23, 0.0  ;;  %v72_v46 = vsel %vm41_vm0, %v23_v29, 0.0  ;;  %v74_v47 = vsel %vm41_vm0, %v22_v28, 0.0  ;;  %v29_v49 = vld [vmem:[%s1451_s0 + $0xa0] sm:$0xff] }
   0x9   :  { %v979_v44 = vmul.f32 0.33333334, %v57_v35  ;;  %v71_v45 = vadd.f32 %v70_v43, %v62_v31  ;;  %v31_v50 = vld [vmem:[%s1451_s0 + $0xb0] sm:$0xff]  ;;  %v67_v51 = vadd.f32 %v66_v42, %v65_v41  ;;  %v992_v52 = vmul.f32 0.33333334, %v63_v36  ;;  %v30_v55 = vld [vmem:[%s1451_s0 + $0xa8] sm:$0xff] }
   0xa   :  { %v75_v53 = vadd.f32 %v74_v47, %v66_v42  ;;  %v76_v54 = vsel %vm41_vm0, %v24_v32, 0.0  ;;  %v80_v57 = vsel %vm41_vm0, %v25_v33, 0.0  ;;  %v82_v58 = vsel %vm41_vm0, %v27_v39, 0.0  ;;  %v32_v60 = vld [vmem:[%s1451_s0 + $0xb8] sm:$0xff]  ;;  %v33_v61 = vld [vmem:[%s1451_s0 + $0xc0] sm:$0xff]  ;;  %v35_v62 = vld [vmem:[%s1451_s0 + $0xd0] sm:$0xff] }
   0xb   :  { %v73_v56 = vadd.f32 %v72_v46, %v71_v45  ;;  %v84_v59 = vsel %vm41_vm0, %v26_v38, 0.0  ;;  %v1010_v63 = vmul.f32 0.33333334, %v67_v51  ;;  %v81_v1 = vadd.f32 %v80_v57, %v72_v46  ;;  %v34_v7 = vld [vmem:[%s1451_s0 + $0xc8] sm:$0xff]  ;;  %v36_v8 = vld [vmem:[%s1451_s0 + $0xd8] sm:$0xff]  ;;  %v37_v9 = vld [vmem:[%s1451_s0 + $0xe0] sm:$0xff] }
   0xc   :  { %v77_v0 = vadd.f32 %v76_v54, %v75_v53  ;;  %v85_v2 = vadd.f32 %v84_v59, %v76_v54  ;;  %v86_v4 = vsel %vm41_vm0, %v28_v48, 0.0  ;;  %v90_v5 = vsel %vm41_vm0, %v29_v49, 0.0  ;;  %v38_v14 = vld [vmem:[%s1451_s0 + $0xe8] sm:$0xff]  ;;  %v39_v19 = vld [vmem:[%s1451_s0 + $0xf0] sm:$0xff]  ;;  %v40_v20 = vld [vmem:[%s1451_s0 + $0xf8] sm:$0xff]  ;;  %s890_s0 = smov [#allocation2]  }
   0xd   :  { %v1012_v3 = vmul.f32 0.33333334, %v73_v56  ;;  %v92_v6 = vsel %vm41_vm0, %v31_v50, 0.0  ;;  %v83_v11 = vadd.f32 %v82_v58, %v81_v1  ;;  %v91_v13 = vadd.f32 %v90_v5, %v82_v58  ;;  %s854_s12 = sshll.u32 %s890_s0, 4  ;;  %s1419_s12 = int_to_ptr.vmem [resolvable:$true] %s854_s12 }
   0xe   :  { %v1026_v10 = vmul.f32 0.33333334, %v77_v0  ;;  %v87_v12 = vadd.f32 %v86_v4, %v85_v2  ;;  %v94_v15 = vsel %vm41_vm0, %v30_v55, 0.0  ;;  %v96_v16 = vsel %vm41_vm0, %v32_v60, 0.0  ;;  %s868_s13 = scalar_lea.vmem %s1419_s12, 1024  ;;  %p873_p1 = scmp.lt.s32.totalorder %s1419_s12, %s1419_s12 }
   0xf   :  { %v100_v17 = vsel %vm41_vm0, %v33_v61, 0.0  ;;  %v102_v18 = vsel %vm41_vm0, %v35_v62, 0.0  ;;  %v1041_v21 = vmul.f32 0.33333334, %v83_v11  ;;  %v93_v23 = vadd.f32 %v92_v6, %v91_v13  ;;  %p869_p0 = scmp.ne.s32.totalorder %s1419_s12, %s868_s13  ;;  %p874_p2 = scmp.lt.s32.totalorder %s868_s13, %s868_s13 }
  0x10   :  { %v1043_v22 = vmul.f32 0.33333334, %v87_v12  ;;  %v95_v24 = vadd.f32 %v94_v15, %v86_v4  ;;  %v101_v25 = vadd.f32 %v100_v17, %v92_v6  ;;  %v104_v26 = vsel %vm41_vm0, %v34_v7, 0.0 }
  0x11   :  { %v106_v27 = vsel %vm41_vm0, %v36_v8, 0.0  ;;  %v110_v28 = vsel %vm41_vm0, %v37_v9, 0.0  ;;  %v1048_v31 = vmul.f32 0.33333334, %v93_v23  ;;  %v105_v32 = vadd.f32 %v104_v26, %v96_v16  ;;  %p875_p3 = por %p874_p2, %p873_p1 }
  0x12   :  { %v97_v29 = vadd.f32 %v96_v16, %v95_v24  ;;  %v111_v33 = vadd.f32 %v110_v28, %v102_v18  ;;  %v103_v35 = vadd.f32 %v102_v18, %v101_v25  ;;  %v112_v36 = vsel %vm41_vm0, %v39_v19, 0.0 }
  0x13   :  { %v114_v37 = vsel %vm41_vm0, %v38_v14, 0.0  ;;  %v116_v38 = vsel %vm41_vm0, %v40_v20, 0.0  ;;  %v107_v41 = vadd.f32 %v106_v27, %v105_v32  ;;  %v121_v46 = vsel %vm120_vm1, %v957_v30, 0.0  ;;  %p876_p4 = pnand %p875_p3, %p869_p0 }
  0x14   :  { %v1053_v39 = vmul.f32 0.33333334, %v97_v29  ;;  %v113_v42 = vadd.f32 %v112_v36, %v111_v33  ;;  %v115_v43 = vadd.f32 %v114_v37, %v106_v27  ;;  %v1055_v45 = vmul.f32 0.33333334, %v103_v35 }
  0x15   :  { %v128_v47 = vsel %vm120_vm1, %v975_v40, 0.0  ;;  %v135_v48 = vsel %vm120_vm1, %v992_v52, 0.0  ;;  %v1063_v49 = vmul.f32 0.33333334, %v107_v41  ;;  %v122_v53 = vrot.slane %v121_v46, 4 }
  0x16   :  { %v117_v50 = vadd.f32 %v116_v38, %v115_v43  ;;  %v1065_v51 = vmul.f32 0.33333334, %v113_v42  ;;  %v129_v54 = vrot.slane %v128_v47, 4  ;;  %v136_v55 = vrot.slane %v135_v48, 4 }
  0x17   :  { %v142_v56 = vsel %vm120_vm1, %v1012_v3, 0.0  ;;  %v149_v57 = vsel %vm120_vm1, %v1041_v21, 0.0  ;;  %v123_v59 = vadd.f32 %v122_v53, %v121_v46  ;;  %v156_v1 = vsel %vm120_vm1, %v1048_v31, 0.0 }
  0x18   :  { %v1071_v58 = vmul.f32 0.33333334, %v117_v50  ;;  %v143_v60 = vrot.slane %v142_v56, 4  ;;  %v150_v61 = vrot.slane %v149_v57, 4  ;;  %v130_v62 = vadd.f32 %v129_v54, %v128_v47 }
  0x19   :  { %v137_v0 = vadd.f32 %v136_v55, %v135_v48  ;;  %v163_v2 = vsel %vm120_vm1, %v1055_v45, 0.0  ;;  %v124_v4 = vrot.slane %v123_v59, 2  ;;  %v157_v7 = vrot.slane %v156_v1, 4 }
  0x1a   :  { %v144_v5 = vadd.f32 %v143_v60, %v142_v56  ;;  %v151_v6 = vadd.f32 %v150_v61, %v149_v57  ;;  %v131_v8 = vrot.slane %v130_v62, 2  ;;  %v164_v11 = vrot.slane %v163_v2, 4 }
  0x1b   :  { %v138_v9 = vrot.slane %v137_v0, 2  ;;  %v170_v12 = vsel %vm120_vm1, %v1065_v51, 0.0  ;;  %v125_v13 = vadd.f32 %v124_v4, %v123_v59  ;;  %v158_v16 = vadd.f32 %v157_v7, %v156_v1 }
  0x1c   :  { %v145_v14 = vrot.slane %v144_v5, 2  ;;  %v152_v15 = vrot.slane %v151_v6, 2  ;;  %v132_v17 = vadd.f32 %v131_v8, %v130_v62  ;;  %v165_v19 = vadd.f32 %v164_v11, %v163_v2 }
  0x1d   :  { %v139_v18 = vadd.f32 %v138_v9, %v137_v0  ;;  %v171_v20 = vrot.slane %v170_v12, 4  ;;  %v126_v23 = vrot.slane %v125_v13, 1  ;;  %v159_v26 = vrot.slane %v158_v16, 2 }
  0x1e   :  { %v146_v24 = vadd.f32 %v145_v14, %v144_v5  ;;  %v153_v25 = vadd.f32 %v152_v15, %v151_v6  ;;  %v133_v27 = vrot.slane %v132_v17, 1  ;;  %v166_v29 = vrot.slane %v165_v19, 2 }
  0x1f   :  { %v140_v28 = vrot.slane %v139_v18, 1  ;;  %v172_v32 = vadd.f32 %v171_v20, %v170_v12  ;;  %v127_v33 = vadd.f32 %v126_v23, %v125_v13  ;;  %v160_v37 = vadd.f32 %v159_v26, %v158_v16 }
  0x20   :  { %v147_v35 = vrot.slane %v146_v24, 1  ;;  %v154_v36 = vrot.slane %v153_v25, 1  ;;  %v134_v38 = vadd.f32 %v133_v27, %v132_v17  ;;  %v167_v42 = vadd.f32 %v166_v29, %v165_v19 }
  0x21   :  { %v141_v41 = vadd.f32 %v140_v28, %v139_v18  ;;  %v173_v43 = vrot.slane %v172_v32, 2  ;;  %v161_v48 = vrot.slane %v160_v37, 1  ;;  %v1079_v50 = vmul.f32 0.33333334, %v127_v33 }
  0x22   :  { %v148_v46 = vadd.f32 %v147_v35, %v146_v24  ;;  %v155_v47 = vadd.f32 %v154_v36, %v153_v25  ;;  %v168_v53 = vrot.slane %v167_v42, 1  ;;  %v1081_v55 = vmul.f32 0.33333334, %v134_v38 }
  0x23   :  { %v174_v54 = vadd.f32 %v173_v43, %v172_v32  ;;  %v1083_v56 = vmul.f32 0.33333334, %v141_v41  ;;  %v162_v57 = vadd.f32 %v161_v48, %v160_v37  ;;  %v193_v61 = vrot.slane %v957_v30, 1 }
  0x24   :  { %v1085_v59 = vmul.f32 0.33333334, %v148_v46  ;;  %v1087_v60 = vmul.f32 0.33333334, %v155_v47  ;;  %v169_v62 = vadd.f32 %v168_v53, %v167_v42  ;;  %v194_v1 = vrot.slane %v975_v40, 1 }
  0x25   :  { %v175_v0 = vrot.slane %v174_v54, 1  ;;  %v195_v2 = vrot.slane %v992_v52, 1  ;;  %v1092_v4 = vmul.f32 0.33333334, %v162_v57  ;;  %v196_v5 = vrot.slane %v1012_v3, 1 }
  0x26   :  { %v197_v6 = vrot.slane %v1041_v21, 1  ;;  %v198_v7 = vrot.slane %v1048_v31, 1  ;;  %v1097_v9 = vmul.f32 0.33333334, %v169_v62  ;;  %v199_v11 = vrot.slane %v1055_v45, 1 }
  0x27   :  { %v176_v8 = vadd.f32 %v175_v0, %v174_v54  ;;  %v200_v12 = vrot.slane %v1065_v51, 1  ;;  %v210_v13 = vsel %vm209_vm2, %v193_v61, 0.0  ;;  %v217_v14 = vsel %vm209_vm2, %v194_v1, 0.0 }
  0x28   :  { %v224_v15 = vsel %vm209_vm2, %v195_v2, 0.0  ;;  %v231_v16 = vsel %vm209_vm2, %v196_v5, 0.0  ;;  %v211_v18 = vrot.slane %v210_v13, 4  ;;  %v218_v19 = vrot.slane %v217_v14, 4 }
  0x29   :  { %v1105_v17 = vmul.f32 0.33333334, %v176_v8  ;;  %v225_v20 = vrot.slane %v224_v15, 4  ;;  %v232_v23 = vrot.slane %v231_v16, 4  ;;  %v238_v24 = vsel %vm209_vm2, %v197_v6, 0.0 }
  0x2a   :  { %v245_v25 = vsel %vm209_vm2, %v198_v7, 0.0  ;;  %v252_v26 = vsel %vm209_vm2, %v199_v11, 0.0  ;;  %v212_v27 = vadd.f32 %v211_v18, %v210_v13  ;;  %v219_v28 = vadd.f32 %v218_v19, %v217_v14 }
  0x2b   :  { %1453 = vst [vmem:[#allocation5_spill] sm:$0xff] %v1105_v17  ;;  %v226_v29 = vadd.f32 %v225_v20, %v224_v15  ;;  %v239_v32 = vrot.slane %v238_v24, 4  ;;  %v233_v33 = vadd.f32 %v232_v23, %v231_v16  ;;  %v246_v35 = vrot.slane %v245_v25, 4 }
  0x2c   :  { %v253_v36 = vrot.slane %v252_v26, 4  ;;  %v259_v37 = vsel %vm209_vm2, %v200_v12, 0.0  ;;  %v213_v38 = vrot.slane %v212_v27, 2  ;;  %v220_v41 = vrot.slane %v219_v28, 2 }
  0x2d   :  { %v227_v42 = vrot.slane %v226_v29, 2  ;;  %v240_v43 = vadd.f32 %v239_v32, %v238_v24  ;;  %v234_v46 = vrot.slane %v233_v33, 2  ;;  %v247_v47 = vadd.f32 %v246_v35, %v245_v25 }
  0x2e   :  { %v254_v48 = vadd.f32 %v253_v36, %v252_v26  ;;  %v260_v53 = vrot.slane %v259_v37, 4  ;;  %v214_v54 = vadd.f32 %v213_v38, %v212_v27  ;;  %v221_v57 = vadd.f32 %v220_v41, %v219_v28 }
  0x2f   :  { %v228_v61 = vadd.f32 %v227_v42, %v226_v29  ;;  %v241_v62 = vrot.slane %v240_v43, 2  ;;  %v235_v0 = vadd.f32 %v234_v46, %v233_v33  ;;  %v248_v1 = vrot.slane %v247_v47, 2 }
  0x30   :  { %v255_v2 = vrot.slane %v254_v48, 2  ;;  %v261_v5 = vadd.f32 %v260_v53, %v259_v37  ;;  %v215_v6 = vrot.slane %v214_v54, 1  ;;  %v222_v7 = vrot.slane %v221_v57, 1 }
  0x31   :  { %v229_v8 = vrot.slane %v228_v61, 1  ;;  %v242_v11 = vadd.f32 %v241_v62, %v240_v43  ;;  %v236_v12 = vrot.slane %v235_v0, 1  ;;  %v249_v13 = vadd.f32 %v248_v1, %v247_v47 }
  0x32   :  { %v256_v14 = vadd.f32 %v255_v2, %v254_v48  ;;  %v262_v15 = vrot.slane %v261_v5, 2  ;;  %v216_v16 = vadd.f32 %v215_v6, %v214_v54  ;;  %v223_v18 = vadd.f32 %v222_v7, %v221_v57 }
  0x33   :  { %v230_v19 = vadd.f32 %v229_v8, %v228_v61  ;;  %v243_v20 = vrot.slane %v242_v11, 1  ;;  %v237_v23 = vadd.f32 %v236_v12, %v235_v0  ;;  %v250_v24 = vrot.slane %v249_v13, 1 }
  0x34   :  { %v257_v25 = vrot.slane %v256_v14, 1  ;;  %v263_v26 = vadd.f32 %v262_v15, %v261_v5  ;;  %v1111_v28 = vmul.f32 0.33333334, %v216_v16  ;;  %v1113_v29 = vmul.f32 0.33333334, %v223_v18 }
  0x35   :  { %v244_v27 = vadd.f32 %v243_v20, %v242_v11  ;;  %v1115_v32 = vmul.f32 0.33333334, %v230_v19  ;;  %v251_v33 = vadd.f32 %v250_v24, %v249_v13  ;;  %v1117_v37 = vmul.f32 0.33333334, %v237_v23 }
  0x36   :  { %v258_v35 = vadd.f32 %v257_v25, %v256_v14  ;;  %v264_v36 = vrot.slane %v263_v26, 1  ;;  %v274_v41 = vrot.slane %v957_v30, 3  ;;  %v275_v42 = vrot.slane %v975_v40, 3 }
  0x37   :  { %v1119_v38 = vmul.f32 0.33333334, %v244_v27  ;;  %v276_v43 = vrot.slane %v992_v52, 3  ;;  %v1124_v47 = vmul.f32 0.33333334, %v251_v33  ;;  %v277_v53 = vrot.slane %v1012_v3, 3 }
  0x38   :  { %v265_v46 = vadd.f32 %v264_v36, %v263_v26  ;;  %v1126_v48 = vmul.f32 0.33333334, %v258_v35  ;;  %v278_v54 = vrot.slane %v1041_v21, 3  ;;  %v279_v57 = vrot.slane %v1048_v31, 3 }
  0x39   :  { %v280_v61 = vrot.slane %v1055_v45, 3  ;;  %v281_v62 = vrot.slane %v1065_v51, 3  ;;  %v290_v1 = vsel %vm209_vm2, %v274_v41, 0.0  ;;  %v297_v2 = vsel %vm209_vm2, %v275_v42, 0.0 }
  0x3a   :  { %v1133_v0 = vmul.f32 0.33333334, %v265_v46  ;;  %v304_v5 = vsel %vm209_vm2, %v276_v43, 0.0  ;;  %v291_v6 = vrot.slane %v290_v1, 4  ;;  %v298_v7 = vrot.slane %v297_v2, 4 }
  0x3b   :  { %v305_v8 = vrot.slane %v304_v5, 4  ;;  %v311_v11 = vsel %vm209_vm2, %v277_v53, 0.0  ;;  %v318_v13 = vsel %vm209_vm2, %v278_v54, 0.0  ;;  %v325_v14 = vsel %vm209_vm2, %v279_v57, 0.0 }
  0x3c   :  { %1454 = vst [vmem:[#allocation6_spill] sm:$0xff] %v1133_v0  ;;  %v312_v12 = vrot.slane %v311_v11, 4  ;;  %v332_v15 = vsel %vm209_vm2, %v280_v61, 0.0  ;;  %v292_v16 = vadd.f32 %v291_v6, %v290_v1  ;;  %v299_v18 = vadd.f32 %v298_v7, %v297_v2 }
  0x3d   :  { %v306_v19 = vadd.f32 %v305_v8, %v304_v5  ;;  %v319_v20 = vrot.slane %v318_v13, 4  ;;  %v326_v24 = vrot.slane %v325_v14, 4  ;;  %v333_v25 = vrot.slane %v332_v15, 4 }
  0x3e   :  { %v313_v23 = vadd.f32 %v312_v12, %v311_v11  ;;  %v339_v26 = vsel %vm209_vm2, %v281_v62, 0.0  ;;  %v293_v27 = vrot.slane %v292_v16, 2  ;;  %v300_v33 = vrot.slane %v299_v18, 2 }
  0x3f   :  { %v307_v35 = vrot.slane %v306_v19, 2  ;;  %v320_v36 = vadd.f32 %v319_v20, %v318_v13  ;;  %v327_v42 = vadd.f32 %v326_v24, %v325_v14  ;;  %v334_v43 = vadd.f32 %v333_v25, %v332_v15 }
  0x40   :  { %v314_v41 = vrot.slane %v313_v23, 2  ;;  %v340_v46 = vrot.slane %v339_v26, 4  ;;  %v294_v53 = vadd.f32 %v293_v27, %v292_v16  ;;  %v301_v54 = vadd.f32 %v300_v33, %v299_v18 }
  0x41   :  { %v308_v57 = vadd.f32 %v307_v35, %v306_v19  ;;  %v321_v61 = vrot.slane %v320_v36, 2  ;;  %v328_v2 = vrot.slane %v327_v42, 2  ;;  %v335_v5 = vrot.slane %v334_v43, 2 }
  0x42   :  { %v315_v1 = vadd.f32 %v314_v41, %v313_v23  ;;  %v341_v6 = vadd.f32 %v340_v46, %v339_v26  ;;  %v295_v7 = vrot.slane %v294_v53, 1  ;;  %v302_v8 = vrot.slane %v301_v54, 1 }
  0x43   :  { %v309_v11 = vrot.slane %v308_v57, 1  ;;  %v322_v62 = vadd.f32 %v321_v61, %v320_v36  ;;  %v329_v17 = vadd.f32 %v328_v2, %v327_v42  ;;  %v336_v0 = vadd.f32 %v335_v5, %v334_v43 }
  0x44   :  { %v316_v12 = vrot.slane %v315_v1, 1  ;;  %v342_v13 = vrot.slane %v341_v6, 2  ;;  %v296_v20 = vadd.f32 %v295_v7, %v294_v53  ;;  %v303_v14 = vadd.f32 %v302_v8, %v301_v54 }
  0x45   :  { %v310_v15 = vadd.f32 %v309_v11, %v308_v57  ;;  %v323_v24 = vrot.slane %v322_v62, 1  ;;  %v330_v18 = vrot.slane %v329_v17, 1  ;;  %v337_v19 = vrot.slane %v336_v0, 1 }
  0x46   :  { %v317_v16 = vadd.f32 %v316_v12, %v315_v1  ;;  %v343_v25 = vadd.f32 %v342_v13, %v341_v6  ;;  %v1143_v27 = vmul.f32 0.33333334, %v296_v20  ;;  %v1145_v26 = vmul.f32 0.33333334, %v303_v14 }
  0x47   :  { %v324_v23 = vadd.f32 %v323_v24, %v322_v62  ;;  %v1147_v33 = vmul.f32 0.33333334, %v310_v15  ;;  %v331_v35 = vadd.f32 %v330_v18, %v329_v17  ;;  %v338_v36 = vadd.f32 %v337_v19, %v336_v0 }
  0x48   :  { %1455 = vst [vmem:[#allocation7_spill] sm:$0xff] %v1143_v27  ;;  %1456 = vst [vmem:[#allocation8_spill] sm:$0xff] %v1145_v26  ;;  %v344_v41 = vrot.slane %v343_v25, 1  ;;  %v1149_v42 = vmul.f32 0.33333334, %v317_v16  ;;  %v354_v46 = vrot.slane %v957_v30, 5 }
  0x49   :  { %1457 = vst [vmem:[#allocation9_spill] sm:$0xff] %v1147_v33  ;;  %v1151_v43 = vmul.f32 0.33333334, %v324_v23  ;;  %v355_v53 = vrot.slane %v975_v40, 5  ;;  %v356_v54 = vrot.slane %v992_v52, 5  ;;  %v357_v2 = vrot.slane %v1012_v3, 5 }
  0x4a   :  { %1458 = vst [vmem:[#allocation10_spill] sm:$0xff] %v1149_v42  ;;  %v345_v57 = vadd.f32 %v344_v41, %v343_v25  ;;  %v1156_v61 = vmul.f32 0.33333334, %v331_v35  ;;  %v1158_v1 = vmul.f32 0.33333334, %v338_v36  ;;  %v358_v17 = vrot.slane %v1041_v21, 5 }
  0x4b   :  { %1459 = vst [vmem:[#allocation11_spill] sm:$0xff] %v1151_v43  ;;  %v359_v0 = vrot.slane %v1048_v31, 5  ;;  %v360_v5 = vrot.slane %v1055_v45, 5  ;;  %v361_v6 = vrot.slane %v1065_v51, 5  ;;  %v370_v8 = vsel %vm209_vm2, %v354_v46, 0.0 }
  0x4c   :  { %1460 = vst [vmem:[#allocation12_spill] sm:$0xff] %v1156_v61  ;;  %1461 = vst [vmem:[#allocation13_spill] sm:$0xff] %v1158_v1  ;;  %v1165_v7 = vmul.f32 0.33333334, %v345_v57  ;;  %v377_v11 = vsel %vm209_vm2, %v355_v53, 0.0  ;;  %v384_v62 = vsel %vm209_vm2, %v356_v54, 0.0 }
  0x4d   :  { %v371_v12 = vrot.slane %v370_v8, 4  ;;  %v378_v13 = vrot.slane %v377_v11, 4  ;;  %v385_v20 = vrot.slane %v384_v62, 4  ;;  %v391_v14 = vsel %vm209_vm2, %v357_v2, 0.0 }
  0x4e   :  { %1462 = vst [vmem:[#allocation14_spill] sm:$0xff] %v1165_v7  ;;  %v392_v15 = vrot.slane %v391_v14, 4  ;;  %v398_v24 = vsel %vm209_vm2, %v358_v17, 0.0  ;;  %v405_v16 = vsel %vm209_vm2, %v359_v0, 0.0  ;;  %v412_v18 = vsel %vm209_vm2, %v360_v5, 0.0 }
  0x4f   :  { %v372_v19 = vadd.f32 %v371_v12, %v370_v8  ;;  %v379_v25 = vadd.f32 %v378_v13, %v377_v11  ;;  %v386_v23 = vadd.f32 %v385_v20, %v384_v62  ;;  %v399_v35 = vrot.slane %v398_v24, 4 }
  0x50   :  { %v393_v36 = vadd.f32 %v392_v15, %v391_v14  ;;  %v406_v41 = vrot.slane %v405_v16, 4  ;;  %v413_v46 = vrot.slane %v412_v18, 4  ;;  %v419_v53 = vsel %vm209_vm2, %v361_v6, 0.0 }
  0x51   :  { %v373_v54 = vrot.slane %v372_v19, 2  ;;  %v380_v57 = vrot.slane %v379_v25, 2  ;;  %v387_v7 = vrot.slane %v386_v23, 2  ;;  %v400_v2 = vadd.f32 %v399_v35, %v398_v24 }
  0x52   :  { %v394_v1 = vrot.slane %v393_v36, 2  ;;  %v407_v61 = vadd.f32 %v406_v41, %v405_v16  ;;  %v414_v17 = vadd.f32 %v413_v46, %v412_v18  ;;  %v420_v43 = vrot.slane %v419_v53, 4 }
  0x53   :  { %v374_v0 = vadd.f32 %v373_v54, %v372_v19  ;;  %v381_v42 = vadd.f32 %v380_v57, %v379_v25  ;;  %v388_v5 = vadd.f32 %v387_v7, %v386_v23  ;;  %v401_v8 = vrot.slane %v400_v2, 2 }
  0x54   :  { %v395_v11 = vadd.f32 %v394_v1, %v393_v36  ;;  %v408_v62 = vrot.slane %v407_v61, 2  ;;  %v415_v12 = vrot.slane %v414_v17, 2  ;;  %v421_v13 = vadd.f32 %v420_v43, %v419_v53 }
  0x55   :  { %v375_v20 = vrot.slane %v374_v0, 1  ;;  %v382_v14 = vrot.slane %v381_v42, 1  ;;  %v389_v15 = vrot.slane %v388_v5, 1  ;;  %v402_v6 = vadd.f32 %v401_v8, %v400_v2 }
  0x56   :  { %v396_v33 = vrot.slane %v395_v11, 1  ;;  %v409_v26 = vadd.f32 %v408_v62, %v407_v61  ;;  %v416_v27 = vadd.f32 %v415_v12, %v414_v17  ;;  %v422_v24 = vrot.slane %v421_v13, 2 }
  0x57   :  { %v376_v35 = vadd.f32 %v375_v20, %v374_v0  ;;  %v383_v16 = vadd.f32 %v382_v14, %v381_v42  ;;  %v390_v18 = vadd.f32 %v389_v15, %v388_v5  ;;  %v403_v41 = vrot.slane %v402_v6, 1 }
  0x58   :  { %v397_v19 = vadd.f32 %v396_v33, %v395_v11  ;;  %v410_v25 = vrot.slane %v409_v26, 1  ;;  %v417_v7 = vrot.slane %v416_v27, 1  ;;  %v423_v23 = vadd.f32 %v422_v24, %v421_v13 }
  0x59   :  { %v404_v1 = vadd.f32 %v403_v41, %v402_v6  ;;  %v1175_v36 = vmul.f32 0.33333334, %v376_v35  ;;  %v1177_v43 = vmul.f32 0.33333334, %v383_v16  ;;  %v1179_v46 = vmul.f32 0.33333334, %v390_v18 }
  0x5a   :  { %v411_v53 = vadd.f32 %v410_v25, %v409_v26  ;;  %v418_v54 = vadd.f32 %v417_v7, %v416_v27  ;;  %v424_v61 = vrot.slane %v423_v23, 1  ;;  %v1181_v57 = vmul.f32 0.33333334, %v397_v19 }
  0x5b   :  { %v1183_v2 = vmul.f32 0.33333334, %v404_v1  ;;  %v443_v33 = vrot.slane %v957_v30, 7  ;;  %v444_v42 = vrot.slane %v966_v34, 7  ;;  %v446_v8 = vrot.slane %v975_v40, 7 }
  0x5c   :  { %v425_v17 = vadd.f32 %v424_v61, %v423_v23  ;;  %v1187_v0 = vmul.f32 0.33333334, %v411_v53  ;;  %v1189_v5 = vmul.f32 0.33333334, %v418_v54  ;;  %v447_v27 = vrot.slane %v979_v44, 7 }
  0x5d   :  { %v445_v26 = vsel %vm442_vm3, %v443_v33, %v444_v42  ;;  %v449_v11 = vrot.slane %v992_v52, 7  ;;  %v450_v62 = vrot.slane %v1010_v63, 7  ;;  %v452_v30 = vrot.slane %v1012_v3, 7 }
  0x5e   :  { %v1196_v12 = vmul.f32 0.33333334, %v425_v17  ;;  %v453_v13 = vrot.slane %v1026_v10, 7  ;;  %v455_v20 = vrot.slane %v1041_v21, 7  ;;  %v448_v14 = vsel %vm442_vm3, %v446_v8, %v447_v27 }
  0x5f   :  { %v451_v40 = vsel %vm442_vm3, %v449_v11, %v450_v62  ;;  %v456_v15 = vrot.slane %v1043_v22, 7  ;;  %v458_v6 = vrot.slane %v1048_v31, 7  ;;  %v459_v24 = vrot.slane %v1053_v39, 7 }
  0x60   :  { %1463 = vst [vmem:[#allocation15_spill] sm:$0xff] %v1196_v12  ;;  %v454_v52 = vsel %vm442_vm3, %v452_v30, %v453_v13  ;;  %v461_v35 = vrot.slane %v1055_v45, 7  ;;  %v462_v3 = vrot.slane %v1063_v49, 7  ;;  %v464_v21 = vrot.slane %v1065_v51, 7 }
  0x61   :  { %v457_v16 = vsel %vm442_vm3, %v455_v20, %v456_v15  ;;  %v465_v18 = vrot.slane %v1071_v58, 7  ;;  %v475_v41 = vsel %vm209_vm2, %v445_v26, 0.0  ;;  %v460_v19 = vsel %vm442_vm3, %v458_v6, %v459_v24 }
  0x62   :  { %v463_v31 = vsel %vm442_vm3, %v461_v35, %v462_v3  ;;  %v476_v25 = vrot.slane %v475_v41, 4  ;;  %v482_v7 = vsel %vm209_vm2, %v448_v14, 0.0  ;;  %v489_v1 = vsel %vm209_vm2, %v451_v40, 0.0 }
  0x63   :  { %v466_v23 = vsel %vm442_vm3, %v464_v21, %v465_v18  ;;  %v483_v45 = vrot.slane %v482_v7, 4  ;;  %v496_v53 = vsel %vm209_vm2, %v454_v52, 0.0  ;;  %v490_v51 = vrot.slane %v489_v1, 4 }
  0x64   :  { %v477_v54 = vadd.f32 %v476_v25, %v475_v41  ;;  %v497_v61 = vrot.slane %v496_v53, 4  ;;  %v503_v33 = vsel %vm209_vm2, %v457_v16, 0.0  ;;  %v510_v8 = vsel %vm209_vm2, %v460_v19, 0.0 }
  0x65   :  { %v484_v42 = vadd.f32 %v483_v45, %v482_v7  ;;  %v504_v17 = vrot.slane %v503_v33, 4  ;;  %v517_v26 = vsel %vm209_vm2, %v463_v31, 0.0  ;;  %v491_v11 = vadd.f32 %v490_v51, %v489_v1 }
  0x66   :  { %v478_v27 = vrot.slane %v477_v54, 2  ;;  %v498_v62 = vadd.f32 %v497_v61, %v496_v53  ;;  %v511_v30 = vrot.slane %v510_v8, 4  ;;  %v518_v14 = vrot.slane %v517_v26, 4 }
  0x67   :  { %v485_v13 = vrot.slane %v484_v42, 2  ;;  %v505_v20 = vadd.f32 %v504_v17, %v503_v33  ;;  %v524_v40 = vsel %vm209_vm2, %v466_v23, 0.0  ;;  %v492_v6 = vrot.slane %v491_v11, 2 }
  0x68   :  { %v479_v15 = vadd.f32 %v478_v27, %v477_v54  ;;  %v499_v52 = vrot.slane %v498_v62, 2  ;;  %v512_v24 = vadd.f32 %v511_v30, %v510_v8  ;;  %v519_v16 = vadd.f32 %v518_v14, %v517_v26 }
  0x69   :  { %v486_v35 = vadd.f32 %v485_v13, %v484_v42  ;;  %v506_v3 = vrot.slane %v505_v20, 2  ;;  %v525_v21 = vrot.slane %v524_v40, 4  ;;  %v493_v41 = vadd.f32 %v492_v6, %v491_v11 }
  0x6a   :  { %v480_v18 = vrot.slane %v479_v15, 1  ;;  %v500_v19 = vadd.f32 %v499_v52, %v498_v62  ;;  %v513_v31 = vrot.slane %v512_v24, 2  ;;  %v520_v45 = vrot.slane %v519_v16, 2 }
  0x6b   :  { %v487_v25 = vrot.slane %v486_v35, 1  ;;  %v507_v7 = vadd.f32 %v506_v3, %v505_v20  ;;  %v526_v1 = vadd.f32 %v525_v21, %v524_v40  ;;  %v494_v51 = vrot.slane %v493_v41, 1 }
  0x6c   :  { %v481_v53 = vadd.f32 %v480_v18, %v479_v15  ;;  %v501_v61 = vrot.slane %v500_v19, 1  ;;  %v514_v23 = vadd.f32 %v513_v31, %v512_v24  ;;  %v521_v17 = vadd.f32 %v520_v45, %v519_v16 }
  0x6d   :  { %v488_v54 = vadd.f32 %v487_v25, %v486_v35  ;;  %v508_v33 = vrot.slane %v507_v7, 1  ;;  %v527_v8 = vrot.slane %v526_v1, 2  ;;  %v495_v42 = vadd.f32 %v494_v51, %v493_v41 }
  0x6e   :  { %v502_v27 = vadd.f32 %v501_v61, %v500_v19  ;;  %v515_v26 = vrot.slane %v514_v23, 1  ;;  %v1223_v30 = vmul.f32 0.33333334, %v481_v53  ;;  %v522_v62 = vrot.slane %v521_v17, 1 }
  0x6f   :  { %v509_v11 = vadd.f32 %v508_v33, %v507_v7  ;;  %v528_v13 = vadd.f32 %v527_v8, %v526_v1  ;;  %v1225_v14 = vmul.f32 0.33333334, %v488_v54  ;;  %v1227_v40 = vmul.f32 0.33333334, %v495_v42 }
  0x70   :  { %1464 = vst [vmem:[#allocation16_spill] sm:$0xff] %v1223_v30  ;;  %v516_v20 = vadd.f32 %v515_v26, %v514_v23  ;;  %v1229_v15 = vmul.f32 0.33333334, %v502_v27  ;;  %v539_v6 = vrot.slane %v966_v34, 1  ;;  %v523_v52 = vadd.f32 %v522_v62, %v521_v17 }
  0x71   :  { %1465 = vst [vmem:[#allocation17_spill] sm:$0xff] %v1225_v14  ;;  %1466 = vst [vmem:[#allocation18_spill] sm:$0xff] %v1227_v40  ;;  %v529_v24 = vrot.slane %v528_v13, 1  ;;  %v1232_v35 = vmul.f32 0.33333334, %v509_v11  ;;  %v540_v3 = vrot.slane %v979_v44, 1 }
  0x72   :  { %1467 = vst [vmem:[#allocation19_spill] sm:$0xff] %v1229_v15  ;;  %v1235_v16 = vmul.f32 0.33333334, %v516_v20  ;;  %v541_v21 = vrot.slane %v1010_v63, 1  ;;  %v542_v18 = vrot.slane %v1026_v10, 1  ;;  %v543_v41 = vrot.slane %v1043_v22, 1 }
  0x73   :  { %1468 = vst [vmem:[#allocation20_spill] sm:$0xff] %v1232_v35  ;;  %v530_v19 = vadd.f32 %v529_v24, %v528_v13  ;;  %v1240_v31 = vmul.f32 0.33333334, %v523_v52  ;;  %v544_v25 = vrot.slane %v1053_v39, 1  ;;  %v545_v7 = vrot.slane %v1063_v49, 1 }
  0x74   :  { %1469 = vst [vmem:[#allocation21_spill] sm:$0xff] %v1235_v16  ;;  %v546_v45 = vrot.slane %v1071_v58, 1  ;;  %v555_v1 = vsel %vm209_vm2, %v539_v6, 0.0  ;;  %v562_v53 = vsel %vm209_vm2, %v540_v3, 0.0  ;;  %v569_v51 = vsel %vm209_vm2, %v541_v21, 0.0 }
  0x75   :  { %1470 = vst [vmem:[#allocation22_spill] sm:$0xff] %v1240_v31  ;;  %v1248_v61 = vmul.f32 0.33333334, %v530_v19  ;;  %v556_v23 = vrot.slane %v555_v1, 4  ;;  %v563_v54 = vrot.slane %v562_v53, 4  ;;  %v570_v33 = vrot.slane %v569_v51, 4 }
  0x76   :  { %v576_v17 = vsel %vm209_vm2, %v542_v18, 0.0  ;;  %v583_v8 = vsel %vm209_vm2, %v543_v41, 0.0  ;;  %v590_v42 = vsel %vm209_vm2, %v544_v25, 0.0  ;;  %v597_v27 = vsel %vm209_vm2, %v545_v7, 0.0 }
  0x77   :  { %1471 = vst [vmem:[#allocation23_spill] sm:$0xff] %v1248_v61  ;;  %v557_v26 = vadd.f32 %v556_v23, %v555_v1  ;;  %v564_v11 = vadd.f32 %v563_v54, %v562_v53  ;;  %v571_v62 = vadd.f32 %v570_v33, %v569_v51  ;;  %v577_v13 = vrot.slane %v576_v17, 4 }
  0x78   :  { %v584_v20 = vrot.slane %v583_v8, 4  ;;  %v591_v6 = vrot.slane %v590_v42, 4  ;;  %v598_v52 = vrot.slane %v597_v27, 4  ;;  %v604_v24 = vsel %vm209_vm2, %v546_v45, 0.0 }
  0x79   :  { %v558_v3 = vrot.slane %v557_v26, 2  ;;  %v565_v21 = vrot.slane %v564_v11, 2  ;;  %v572_v19 = vrot.slane %v571_v62, 2  ;;  %v578_v61 = vadd.f32 %v577_v13, %v576_v17 }
  0x7a   :  { %v585_v18 = vadd.f32 %v584_v20, %v583_v8  ;;  %v592_v31 = vadd.f32 %v591_v6, %v590_v42  ;;  %v599_v41 = vadd.f32 %v598_v52, %v597_v27  ;;  %v605_v16 = vrot.slane %v604_v24, 4 }
  0x7b   :  { %v559_v25 = vadd.f32 %v558_v3, %v557_v26  ;;  %v566_v35 = vadd.f32 %v565_v21, %v564_v11  ;;  %v573_v7 = vadd.f32 %v572_v19, %v571_v62  ;;  %v579_v1 = vrot.slane %v578_v61, 2 }
  0x7c   :  { %v586_v53 = vrot.slane %v585_v18, 2  ;;  %v593_v51 = vrot.slane %v592_v31, 2  ;;  %v600_v23 = vrot.slane %v599_v41, 2  ;;  %v606_v54 = vadd.f32 %v605_v16, %v604_v24 }
  0x7d   :  { %v560_v33 = vrot.slane %v559_v25, 1  ;;  %v567_v15 = vrot.slane %v566_v35, 1  ;;  %v574_v40 = vrot.slane %v573_v7, 1  ;;  %v580_v45 = vadd.f32 %v579_v1, %v578_v61 }
  0x7e   :  { %v587_v14 = vadd.f32 %v586_v53, %v585_v18  ;;  %v594_v30 = vadd.f32 %v593_v51, %v592_v31  ;;  %v601_v12 = vadd.f32 %v600_v23, %v599_v41  ;;  %v607_v17 = vrot.slane %v606_v54, 2 }
  0x7f   :  { %v561_v8 = vadd.f32 %v560_v33, %v559_v25  ;;  %v568_v42 = vadd.f32 %v567_v15, %v566_v35  ;;  %v575_v27 = vadd.f32 %v574_v40, %v573_v7  ;;  %v581_v13 = vrot.slane %v580_v45, 1 }
  0x80   :  { %v588_v26 = vrot.slane %v587_v14, 1  ;;  %v595_v11 = vrot.slane %v594_v30, 1  ;;  %v602_v62 = vrot.slane %v601_v12, 1  ;;  %v608_v20 = vadd.f32 %v607_v17, %v606_v54 }
  0x81   :  { %v582_v6 = vadd.f32 %v581_v13, %v580_v45  ;;  %v1255_v52 = vmul.f32 0.33333334, %v561_v8  ;;  %v1257_v16 = vmul.f32 0.33333334, %v568_v42  ;;  %v1259_v24 = vmul.f32 0.33333334, %v575_v27 }
  0x82   :  { %v589_v61 = vadd.f32 %v588_v26, %v587_v14  ;;  %v596_v3 = vadd.f32 %v595_v11, %v594_v30  ;;  %v603_v31 = vadd.f32 %v602_v62, %v601_v12  ;;  %v609_v21 = vrot.slane %v608_v20, 1 }
  0x83   :  { %1472 = vst [vmem:[#allocation24_spill] sm:$0xff] %v1257_v16  ;;  %1473 = vst [vmem:[#allocation25_spill] sm:$0xff] %v1259_v24  ;;  %v1261_v19 = vmul.f32 0.33333334, %v582_v6  ;;  %v619_v40 = vrot.slane %v966_v34, 3  ;;  %v620_v15 = vrot.slane %v979_v44, 3 }
  0x84   :  { %v621_v35 = vrot.slane %v1010_v63, 3  ;;  %v610_v18 = vadd.f32 %v609_v21, %v608_v20  ;;  %v1266_v41 = vmul.f32 0.33333334, %v589_v61  ;;  %v1268_v25 = vmul.f32 0.33333334, %v596_v3 }
  0x85   :  { %1474 = vst [vmem:[#allocation26_spill] sm:$0xff] %v1261_v19  ;;  %v1270_v7 = vmul.f32 0.33333334, %v603_v31  ;;  %v622_v14 = vrot.slane %v1026_v10, 3  ;;  %v623_v12 = vrot.slane %v1043_v22, 3  ;;  %v624_v30 = vrot.slane %v1053_v39, 3 }
  0x86   :  { %1475 = vst [vmem:[#allocation27_spill] sm:$0xff] %v1266_v41  ;;  %1476 = vst [vmem:[#allocation28_spill] sm:$0xff] %v1268_v25  ;;  %v625_v1 = vrot.slane %v1063_v49, 3  ;;  %v1276_v53 = vmul.f32 0.33333334, %v610_v18  ;;  %v626_v51 = vrot.slane %v1071_v58, 3 }
  0x87   :  { %1477 = vst [vmem:[#allocation29_spill] sm:$0xff] %v1270_v7  ;;  %v635_v23 = vsel %vm209_vm2, %v619_v40, 0.0  ;;  %v642_v54 = vsel %vm209_vm2, %v620_v15, 0.0  ;;  %v649_v17 = vsel %vm209_vm2, %v621_v35, 0.0  ;;  %v656_v8 = vsel %vm209_vm2, %v622_v14, 0.0 }
  0x88   :  { %1478 = vst [vmem:[#allocation30_spill] sm:$0xff] %v1276_v53  ;;  %v636_v33 = vrot.slane %v635_v23, 4  ;;  %v643_v45 = vrot.slane %v642_v54, 4  ;;  %v650_v42 = vrot.slane %v649_v17, 4  ;;  %v657_v27 = vrot.slane %v656_v8, 4 }
  0x89   :  { %v663_v13 = vsel %vm209_vm2, %v623_v12, 0.0  ;;  %v670_v26 = vsel %vm209_vm2, %v624_v30, 0.0  ;;  %v677_v31 = vsel %vm209_vm2, %v625_v1, 0.0  ;;  %v684_v21 = vsel %vm209_vm2, %v626_v51, 0.0 }
  0x8a   :  { %v637_v11 = vadd.f32 %v636_v33, %v635_v23  ;;  %v644_v62 = vadd.f32 %v643_v45, %v642_v54  ;;  %v664_v20 = vrot.slane %v663_v13, 4  ;;  %v671_v6 = vrot.slane %v670_v26, 4 }
  0x8b   :  { %v651_v61 = vadd.f32 %v650_v42, %v649_v17  ;;  %v658_v3 = vadd.f32 %v657_v27, %v656_v8  ;;  %v678_v7 = vrot.slane %v677_v31, 4  ;;  %v685_v12 = vrot.slane %v684_v21, 4 }
  0x8c   :  { %v638_v40 = vrot.slane %v637_v11, 2  ;;  %v645_v15 = vrot.slane %v644_v62, 2  ;;  %v665_v35 = vadd.f32 %v664_v20, %v663_v13  ;;  %v672_v18 = vadd.f32 %v671_v6, %v670_v26 }
  0x8d   :  { %v652_v14 = vrot.slane %v651_v61, 2  ;;  %v659_v53 = vrot.slane %v658_v3, 2  ;;  %v679_v17 = vadd.f32 %v678_v7, %v677_v31  ;;  %v686_v8 = vadd.f32 %v685_v12, %v684_v21 }
  0x8e   :  { %v639_v25 = vadd.f32 %v638_v40, %v637_v11  ;;  %v646_v30 = vadd.f32 %v645_v15, %v644_v62  ;;  %v666_v23 = vrot.slane %v665_v35, 2  ;;  %v673_v54 = vrot.slane %v672_v18, 2 }
  0x8f   :  { %v653_v33 = vadd.f32 %v652_v14, %v651_v61  ;;  %v660_v45 = vadd.f32 %v659_v53, %v658_v3  ;;  %v680_v13 = vrot.slane %v679_v17, 2  ;;  %v687_v26 = vrot.slane %v686_v8, 2 }
  0x90   :  { %v640_v42 = vrot.slane %v639_v25, 1  ;;  %v647_v1 = vrot.slane %v646_v30, 1  ;;  %v667_v27 = vadd.f32 %v666_v23, %v665_v35  ;;  %v674_v51 = vadd.f32 %v673_v54, %v672_v18 }
  0x91   :  { %v654_v41 = vrot.slane %v653_v33, 1  ;;  %v661_v19 = vrot.slane %v660_v45, 1  ;;  %v681_v40 = vadd.f32 %v680_v13, %v679_v17  ;;  %v688_v15 = vadd.f32 %v687_v26, %v686_v8 }
  0x92   :  { %v641_v20 = vadd.f32 %v640_v42, %v639_v25  ;;  %v648_v6 = vadd.f32 %v647_v1, %v646_v30  ;;  %v668_v24 = vrot.slane %v667_v27, 1  ;;  %v675_v16 = vrot.slane %v674_v51, 1 }
  0x93   :  { %v655_v11 = vadd.f32 %v654_v41, %v653_v33  ;;  %v662_v62 = vadd.f32 %v661_v19, %v660_v45  ;;  %v682_v31 = vrot.slane %v681_v40, 1  ;;  %v689_v21 = vrot.slane %v688_v15, 1 }
  0x94   :  { %v669_v61 = vadd.f32 %v668_v24, %v667_v27  ;;  %v676_v53 = vadd.f32 %v675_v16, %v674_v51  ;;  %v1287_v7 = vmul.f32 0.33333334, %v641_v20  ;;  %v1289_v3 = vmul.f32 0.33333334, %v648_v6 }
  0x95   :  { %v1291_v35 = vmul.f32 0.33333334, %v655_v11  ;;  %v1293_v18 = vmul.f32 0.33333334, %v662_v62  ;;  %v699_v19 = vrot.slane %v966_v34, 5  ;;  %v700_v41 = vrot.slane %v979_v44, 5 }
  0x96   :  { %v1295_v25 = vmul.f32 0.33333334, %v669_v61  ;;  %v1297_v14 = vmul.f32 0.33333334, %v676_v53  ;;  %v683_v24 = vadd.f32 %v682_v31, %v681_v40  ;;  %v690_v16 = vadd.f32 %v689_v21, %v688_v15 }
  0x97   :  { %v701_v12 = vrot.slane %v1010_v63, 5  ;;  %v702_v30 = vrot.slane %v1026_v10, 5  ;;  %v703_v23 = vrot.slane %v1043_v22, 5  ;;  %v704_v54 = vrot.slane %v1053_v39, 5 }
  0x98   :  { %v705_v33 = vrot.slane %v1063_v49, 5  ;;  %v706_v45 = vrot.slane %v1071_v58, 5  ;;  %v1307_v17 = vmul.f32 0.33333334, %v683_v24  ;;  %v1309_v8 = vmul.f32 0.33333334, %v690_v16 }
  0x99   :  { %v715_v34 = vsel %vm209_vm2, %v699_v19, 0.0  ;;  %v722_v44 = vsel %vm209_vm2, %v700_v41, 0.0  ;;  %v729_v10 = vsel %vm209_vm2, %v701_v12, 0.0  ;;  %v736_v22 = vsel %vm209_vm2, %v702_v30, 0.0 }
  0x9a   :  { %v716_v42 = vrot.slane %v715_v34, 4  ;;  %v723_v63 = vrot.slane %v722_v44, 4  ;;  %v730_v1 = vrot.slane %v729_v10, 4  ;;  %v737_v39 = vrot.slane %v736_v22, 4 }
  0x9b   :  { %v743_v49 = vsel %vm209_vm2, %v703_v23, 0.0  ;;  %v750_v58 = vsel %vm209_vm2, %v704_v54, 0.0  ;;  %v757_v11 = vsel %vm209_vm2, %v705_v33, 0.0  ;;  %v764_v62 = vsel %vm209_vm2, %v706_v45, 0.0 }
  0x9c   :  { %v717_v27 = vadd.f32 %v716_v42, %v715_v34  ;;  %v724_v51 = vadd.f32 %v723_v63, %v722_v44  ;;  %v744_v13 = vrot.slane %v743_v49, 4  ;;  %v751_v26 = vrot.slane %v750_v58, 4 }
  0x9d   :  { %v731_v20 = vadd.f32 %v730_v1, %v729_v10  ;;  %v738_v6 = vadd.f32 %v737_v39, %v736_v22  ;;  %v758_v19 = vrot.slane %v757_v11, 4  ;;  %v765_v41 = vrot.slane %v764_v62, 4 }
  0x9e   :  { %v718_v40 = vrot.slane %v717_v27, 2  ;;  %v725_v15 = vrot.slane %v724_v51, 2  ;;  %v745_v61 = vadd.f32 %v744_v13, %v743_v49  ;;  %v752_v53 = vadd.f32 %v751_v26, %v750_v58 }
  0x9f   :  { %v732_v31 = vrot.slane %v731_v20, 2  ;;  %v739_v21 = vrot.slane %v738_v6, 2  ;;  %v759_v34 = vadd.f32 %v758_v19, %v757_v11  ;;  %v766_v44 = vadd.f32 %v765_v41, %v764_v62 }
  0xa0   :  { %v719_v24 = vadd.f32 %v718_v40, %v717_v27  ;;  %v726_v16 = vadd.f32 %v725_v15, %v724_v51  ;;  %v746_v12 = vrot.slane %v745_v61, 2  ;;  %v753_v30 = vrot.slane %v752_v53, 2 }
  0xa1   :  { %v733_v23 = vadd.f32 %v732_v31, %v731_v20  ;;  %v740_v54 = vadd.f32 %v739_v21, %v738_v6  ;;  %v760_v1 = vrot.slane %v759_v34, 2  ;;  %v767_v39 = vrot.slane %v766_v44, 2 }
  0xa2   :  { %v720_v42 = vrot.slane %v719_v24, 1  ;;  %v727_v33 = vrot.slane %v726_v16, 1  ;;  %v747_v63 = vadd.f32 %v746_v12, %v745_v61  ;;  %v754_v45 = vadd.f32 %v753_v30, %v752_v53 }
  0xa3   :  { %v734_v10 = vrot.slane %v733_v23, 1  ;;  %v741_v22 = vrot.slane %v740_v54, 1  ;;  %v761_v40 = vadd.f32 %v760_v1, %v759_v34  ;;  %v768_v15 = vadd.f32 %v767_v39, %v766_v44  ;;  %v1488_v1 = vld [vmem:[#allocation14_spill] sm:$0xff] }
  0xa4   :  { %v721_v49 = vadd.f32 %v720_v42, %v719_v24  ;;  %v728_v58 = vadd.f32 %v727_v33, %v726_v16  ;;  %v748_v13 = vrot.slane %v747_v63, 1  ;;  %v755_v26 = vrot.slane %v754_v45, 1  ;;  %v1482_v42 = vld [vmem:[#allocation8_spill] sm:$0xff] }
  0xa5   :  { %v735_v27 = vadd.f32 %v734_v10, %v733_v23  ;;  %v742_v51 = vadd.f32 %v741_v22, %v740_v54  ;;  %v762_v61 = vrot.slane %v761_v40, 1  ;;  %v769_v53 = vrot.slane %v768_v15, 1  ;;  %v1486_v10 = vld [vmem:[#allocation12_spill] sm:$0xff] }
  0xa6   :  { %v749_v20 = vadd.f32 %v748_v13, %v747_v63  ;;  %v756_v6 = vadd.f32 %v755_v26, %v754_v45  ;;  %v1319_v11 = vmul.f32 0.33333334, %v721_v49  ;;  %v1321_v62 = vmul.f32 0.33333334, %v728_v58  ;;  %v1484_v63 = vld [vmem:[#allocation10_spill] sm:$0xff] }
  0xa7   :  { %v1323_v31 = vmul.f32 0.33333334, %v735_v27  ;;  %v1325_v21 = vmul.f32 0.33333334, %v742_v51  ;;  %v779_v24 = vsel %vm442_vm3, %v1079_v50, %v1111_v28  ;;  %v780_v16 = vsel %vm442_vm3, %v1081_v55, %v1113_v29  ;;  %v1479_v28 = vld [vmem:[#allocation6_spill] sm:$0xff]  ;;  %v1480_v29 = vld [vmem:[#allocation5_spill] sm:$0xff] }
  0xa8   :  { %v1327_v19 = vmul.f32 0.33333334, %v749_v20  ;;  %v1329_v41 = vmul.f32 0.33333334, %v756_v6  ;;  %v763_v12 = vadd.f32 %v762_v61, %v761_v40  ;;  %v770_v30 = vadd.f32 %v769_v53, %v768_v15  ;;  %v1489_v15 = vld [vmem:[#allocation15_spill] sm:$0xff]  ;;  %v1491_v20 = vld [vmem:[#allocation17_spill] sm:$0xff] }
  0xa9   :  { %v781_v23 = vsel %vm442_vm3, %v1083_v56, %v1115_v32  ;;  %v782_v54 = vsel %vm442_vm3, %v1085_v59, %v1117_v37  ;;  %v783_v34 = vsel %vm442_vm3, %v1087_v60, %v1119_v38  ;;  %v784_v50 = vsel %vm442_vm3, %v1092_v4, %v1124_v47  ;;  %v1481_v59 = vld [vmem:[#allocation7_spill] sm:$0xff]  ;;  %v1483_v38 = vld [vmem:[#allocation9_spill] sm:$0xff]  ;;  %v1492_v6 = vld [vmem:[#allocation18_spill] sm:$0xff] }
  0xaa   :  { %v785_v55 = vsel %vm442_vm3, %v1097_v9, %v1126_v48  ;;  %v786_v56 = vsel %vm442_vm3, %v1480_v29, %v1479_v28  ;;  %v777_v32 = vmul.f32 0.33333334, %v763_v12  ;;  %v778_v44 = vmul.f32 0.33333334, %v770_v30  ;;  %v1485_v47 = vld [vmem:[#allocation11_spill] sm:$0xff]  ;;  %v1487_v48 = vld [vmem:[#allocation13_spill] sm:$0xff] }
  0xab   :  { %v788_v37 = vsel %vm787_vm4, %v779_v24, %v1481_v59  ;;  %v789_v60 = vsel %vm787_vm4, %v780_v16, %v1482_v42  ;;  %v790_v33 = vsel %vm787_vm4, %v781_v23, %v1483_v38  ;;  %v791_v4 = vsel %vm787_vm4, %v782_v54, %v1484_v63  ;;  %v1494_v24 = vld [vmem:[#allocation20_spill] sm:$0xff]  ;;  %v1495_v16 = vld [vmem:[#allocation21_spill] sm:$0xff]  ;;  %v1497_v23 = vld [vmem:[#allocation23_spill] sm:$0xff] }
  0xac   :  { %v792_v45 = vsel %vm787_vm4, %v783_v34, %v1485_v47  ;;  %v793_v9 = vsel %vm787_vm4, %v784_v50, %v1486_v10  ;;  %v794_v22 = vsel %vm787_vm4, %v785_v55, %v1487_v48  ;;  %v795_v39 = vsel %vm787_vm4, %v786_v56, %v1488_v1  ;;  %v1498_v50 = vld [vmem:[#allocation24_spill] sm:$0xff]  ;;  %v1499_v28 = vld [vmem:[#allocation25_spill] sm:$0xff]  ;;  %v1500_v56 = vld [vmem:[#allocation26_spill] sm:$0xff] }
  0xad   :  { %v797_v49 = vsel %vm796_vm5, %v788_v37, %v1175_v36  ;;  %v798_v58 = vsel %vm796_vm5, %v789_v60, %v1177_v43  ;;  %v799_v13 = vsel %vm796_vm5, %v790_v33, %v1179_v46  ;;  %v800_v26 = vsel %vm796_vm5, %v791_v4, %v1181_v57  ;;  %v1490_v43 = vld [vmem:[#allocation16_spill] sm:$0xff]  ;;  %v1501_v37 = vld [vmem:[#allocation27_spill] sm:$0xff]  ;;  %v1503_v33 = vld [vmem:[#allocation29_spill] sm:$0xff] }
  0xae   :  { %v801_v27 = vsel %vm796_vm5, %v792_v45, %v1183_v2  ;;  %v802_v51 = vsel %vm796_vm5, %v793_v9, %v1187_v0  ;;  %v803_v40 = vsel %vm796_vm5, %v794_v22, %v1189_v5  ;;  %v804_v36 = vsel %vm796_vm5, %v795_v39, %v1489_v15  ;;  %v1493_v2 = vld [vmem:[#allocation19_spill] sm:$0xff]  ;;  %v1496_v5 = vld [vmem:[#allocation22_spill] sm:$0xff]  ;;  %v1502_v60 = vld [vmem:[#allocation28_spill] sm:$0xff] }
  0xaf   :  { %vm814_vm7 = vcmask 1044480   ;;  %vm823_vm8 = vcmask 1045504   ;;  %vm832_vm9 = vcmask 1046528   ;;  %v806_v46 = vsel %vm805_vm6, %v797_v49, %v1490_v43  ;;  %v1504_v63 = vld [vmem:[#allocation30_spill] sm:$0xff] }
  0xb0   :  { %v807_v57 = vsel %vm805_vm6, %v798_v58, %v1491_v20  ;;  %v808_v61 = vsel %vm805_vm6, %v799_v13, %v1492_v6  ;;  %v809_v53 = vsel %vm805_vm6, %v800_v26, %v1493_v2  ;;  %v810_v0 = vsel %vm805_vm6, %v801_v27, %v1494_v24 }
  0xb1   :  { %v811_v12 = vsel %vm805_vm6, %v802_v51, %v1495_v16  ;;  %v812_v30 = vsel %vm805_vm6, %v803_v40, %v1496_v5  ;;  %v813_v54 = vsel %vm805_vm6, %v804_v36, %v1497_v23  ;;  %v815_v34 = vsel %vm814_vm7, %v806_v46, %v1255_v52 }
  0xb2   :  { %v816_v55 = vsel %vm814_vm7, %v807_v57, %v1498_v50  ;;  %v817_v29 = vsel %vm814_vm7, %v808_v61, %v1499_v28  ;;  %v818_v59 = vsel %vm814_vm7, %v809_v53, %v1500_v56  ;;  %v819_v42 = vsel %vm814_vm7, %v810_v0, %v1501_v37 }
  0xb3   :  { %v820_v38 = vsel %vm814_vm7, %v811_v12, %v1502_v60  ;;  %v821_v52 = vsel %vm814_vm7, %v812_v30, %v1503_v33  ;;  %v822_v4 = vsel %vm814_vm7, %v813_v54, %v1504_v63  ;;  %v824_v47 = vsel %vm823_vm8, %v815_v34, %v1287_v7 }
  0xb4   :  { %v825_v45 = vsel %vm823_vm8, %v816_v55, %v1289_v3  ;;  %v826_v10 = vsel %vm823_vm8, %v817_v29, %v1291_v35  ;;  %v827_v9 = vsel %vm823_vm8, %v818_v59, %v1293_v18  ;;  %v828_v48 = vsel %vm823_vm8, %v819_v42, %v1295_v25 }
  0xb5   :  { %v829_v22 = vsel %vm823_vm8, %v820_v38, %v1297_v14  ;;  %v830_v1 = vsel %vm823_vm8, %v821_v52, %v1307_v17  ;;  %v831_v7 = vsel %vm823_vm8, %v822_v4, %v1309_v8  ;;  %v833_v3 = vsel %vm832_vm9, %v824_v47, %v1319_v11 }
  0xb6   :  { %v834_v35 = vsel %vm832_vm9, %v825_v45, %v1321_v62  ;;  %v835_v18 = vsel %vm832_vm9, %v826_v10, %v1323_v31  ;;  %v836_v25 = vsel %vm832_vm9, %v827_v9, %v1325_v21  ;;  %v837_v14 = vsel %vm832_vm9, %v828_v48, %v1327_v19  ;;  %841 = vst.msk [vmem:[#allocation2] sm:$0xff] %vm41_vm0, %v833_v3 }
  0xb7   :  { %v838_v17 = vsel %vm832_vm9, %v829_v22, %v1329_v41  ;;  %v839_v8 = vsel %vm832_vm9, %v830_v1, %v777_v32  ;;  %v840_v11 = vsel %vm832_vm9, %v831_v7, %v778_v44  ;;  %842 = vst.msk [vmem:[#allocation2 + $0x8] sm:$0xff] %vm41_vm0, %v834_v35  ;;  %843 = vst.msk [vmem:[#allocation2 + $0x10] sm:$0xff] %vm41_vm0, %v835_v18 }
  0xb8   :  { %844 = vst.msk [vmem:[#allocation2 + $0x18] sm:$0xff] %vm41_vm0, %v836_v25  ;;  %845 = vst.msk [vmem:[#allocation2 + $0x20] sm:$0xff] %vm41_vm0, %v837_v14 }
  0xb9   :  { %846 = vst.msk [vmem:[#allocation2 + $0x28] sm:$0xff] %vm41_vm0, %v838_v17  ;;  %847 = vst.msk [vmem:[#allocation2 + $0x30] sm:$0xff] %vm41_vm0, %v839_v8 }
  0xba   :  { %848 = vst.msk [vmem:[#allocation2 + $0x38] sm:$0xff] %vm41_vm0, %v840_v11 }
  0xbb   :  { %879 = shalt.err (!%p876_p4)
}
  0xbc   :  { %s891_s14 = smov 128   ;;  %s892_s15 = smov 8  }
  0xbd   :  { %860 = dma.vmem_to_hbm [thread:$0]  %s1419_s12, 1024, %s1452_s1, [#allocation3], %s891_s14, %s891_s14, %s892_s15  }
  0xbe   :  { %888 = dma.done.wait [#allocation3], 1024  }
  0xbf   :  { %889 = vsyncadd [#allocation3], 4294966272 }
  0xc0   :  { %864 = vsyncpa [#allocation3], 1 }

</bundles_post_ra>
